<compile_context>
chip_gen: v5e
topology: v5e:2x2
jax: 0.10.0
libtpu: 0.0.40
codegen_flags: <defaults>
</compile_context>

<pallas_src>
import math
import jax
import jax.numpy as jnp
from jax.experimental import pallas as pl
from jax.experimental.pallas import tpu as pltpu


# --------------------------------------------------------------------------------------
# Kernel: one H_out lane tile per grid step.
# --------------------------------------------------------------------------------------
def _student_pooler_kernel(x_ref,       # (B, H_in)          bf16  VMEM (resident across tiles)
                           wp_ref,      # (L+2, H_in, TN)    bf16  VMEM packed weight planes:
                                        #   planes [0..L-1]: teacher subsets (pre-transposed)
                                        #   plane  L       : Ww^T,  plane L+1 : Bw^T
                           sb_ref,      # (1, TN)            f32   VMEM finished student bias
                           wlw_ref,     # (1, L)             f32   SMEM WeightGenerator.W_l
                           out_ref):    # (B, TN)            f32   VMEM
    L = wp_ref.shape[0] - 2

    # ---- WeightGenerator (this H_out stripe, already transposed):
    #      W'[i, o] = tanh(sum_l subset'[l, i, o] * W_l[l]) * Ww'[i, o] + Bw'[i, o]
    # Fuse the bf16->f32 cast with the first scale; static unroll (L is tiny).
    acc_w = wp_ref[0].astype(jnp.float32) * wlw_ref[0, 0]
    for l in range(1, L):
        acc_w = acc_w + wp_ref[l].astype(jnp.float32) * wlw_ref[0, l]
    student_w = (jnp.tanh(acc_w) * wp_ref[L].astype(jnp.float32)
                 + wp_ref[L + 1].astype(jnp.float32))                 # (H_in, TN) f32

    # ---- F.linear(x, W, b) + Tanh: bf16 x bf16 -> single MXU pass, f32 accumulate.
    y = jnp.dot(x_ref[...], student_w.astype(jnp.bfloat16),
                preferred_element_type=jnp.float32)                   # (B, TN) f32
    out_ref[...] = jnp.tanh(y + sb_ref[...]).astype(out_ref.dtype)


# --------------------------------------------------------------------------------------
# One-time parameter re-layout / down-cast.  Cache the result across forward calls so the
# transposes + casts + packing are NOT on the hot path.
# --------------------------------------------------------------------------------------
def prepare_student_pooler_params(params, param_dtype=jnp.bfloat16):
    L = params["subset_w"].shape[-1]
    # (H_out, H_in, L) -> (L, H_in, H_out): the generated weight comes out transposed, so
    # the kernel matmul contracts x's H_in with dim 0 (no in-kernel transpose).
    sw_t = jnp.transpose(params["subset_w"], (2, 1, 0))               # (L, H_in, H_out)
    ww_t = params["ww"].T[None]                                       # (1, H_in, H_out)
    bw_t = params["bw"].T[None]                                       # (1, H_in, H_out)
    w_planes = jnp.concatenate([sw_t, ww_t, bw_t], axis=0).astype(param_dtype)
    return {
        "w_planes": w_planes,                                         # (L+2, H_in, H_out) bf16
        "wl_w": params["wl_w"].reshape(1, L).astype(jnp.float32),     # (1, L)
        # Bias-generation inputs stay f32; they are tiny and handled in the wrapper.
        "subset_b": params["subset_b"].astype(jnp.float32),           # (H_out, L)
        "wl_b": params["wl_b"].reshape(L, 1).astype(jnp.float32),     # (L, 1)
        "wb": params["wb"].astype(jnp.float32),                       # (H_out,)
        "bb": params["bb"].astype(jnp.float32),                       # (H_out,)
    }


# --------------------------------------------------------------------------------------
# Generation-aware VMEM budgets and lane-tile selection.
# --------------------------------------------------------------------------------------
def _vmem_budgets():
    """(weight-stream budget, vmem_limit cap). Conservative defaults sized for v7x's
    64 MiB per-TC VMEM; raised when the device reports >= 96 MiB (v5e / v6e)."""
    weight_budget, vmem_cap = 14 << 20, 40 << 20
    try:
        info = pltpu.get_tpu_info()
        if getattr(info, "vmem_capacity_bytes", 64 << 20) >= (96 << 20):
            weight_budget, vmem_cap = 44 << 20, 96 << 20
    except Exception:
        pass
    return weight_budget, vmem_cap


def _pick_tile(H_out, H_in, Lp2, itemsize, weight_budget):
    """Largest lane tile (multiple of 128) dividing H_out with grid >= 2 (prefer an even
    grid for v7x two-TC load balance) whose double-buffered packed weight stream PLUS the
    f32 generation temporaries fit the budget.  Falls back to 128 (smallest pipelined
    tile) or full H_out for tiny / non-128-multiple hidden sizes."""
    def fits(tn):
        stream = 2 * Lp2 * H_in * tn * itemsize        # double-buffered packed weight tile
        gen = 3 * H_in * tn * 4                        # f32 acc_w / student_w live stripes
        return stream + gen <= weight_budget

    cands = [tn for tn in range(H_out - (H_out % 128), 127, -128)
             if tn > 0 and H_out % tn == 0 and H_out // tn >= 2]
    for even_only in (True, False):
        for tn in cands:
            if even_only and (H_out // tn) % 2:
                continue
            if fits(tn):
                return tn
    if cands:                       # nothing fits the budget: take the smallest tile
        return cands[-1]
    return H_out                    # tiny / non-128-multiple H_out: single full tile


# --------------------------------------------------------------------------------------
# Wrapper: CLS slice + hoisted bias generation + tiled pallas_call.
# --------------------------------------------------------------------------------------
def student_bert_pooler(hidden_states, prep):
    """hidden_states: (B, S, H) f32; prep: output of prepare_student_pooler_params."""
    B = hidden_states.shape[0]
    Lp2, H_in, H_out = prep["w_planes"].shape
    L = Lp2 - 2
    itemsize = jnp.dtype(prep["w_planes"].dtype).itemsize

    # CLS token, cast once to bf16 (tiny; the bandwidth-dominant tensor is the weight stream).
    x = hidden_states[:, 0, :].astype(jnp.bfloat16)                    # (B, H_in)

    # BiasGenerator hoisted out of the kernel: O((L+2)*H) XLA op, finished (1, H_out) bias.
    student_b = (jnp.tanh((prep["subset_b"] @ prep["wl_b"])[:, 0]) * prep["wb"]
                 + prep["bb"]).reshape(1, H_out).astype(jnp.float32)

    weight_budget, vmem_cap = _vmem_budgets()
    TN = _pick_tile(H_out, H_in, Lp2, itemsize, weight_budget)
    grid = (H_out // TN,)

    # Explicit VMEM accounting: double-buffered packed-weight / bias / out tiles,
    # resident bf16 x, f32 generation temporaries, plus Mosaic scratch headroom.
    db_bytes = 2 * (Lp2 * H_in * TN * itemsize + TN * 4 + B * TN * 4)
    gen_bytes = 3 * H_in * TN * 4
    resident = 2 * B * H_in * 2
    vmem_limit = int(min(max(db_bytes + gen_bytes + resident + (4 << 20), 24 << 20), vmem_cap))

    cost = pl.CostEstimate(
        flops=int(2 * B * H_in * H_out + (2 * L + 4) * H_in * H_out),
        transcendentals=int(H_in * H_out + B * H_out),
        bytes_accessed=int(Lp2 * H_in * H_out * itemsize
                           + B * H_in * 2 + H_out * 4 + B * H_out * 4),
    )

    return pl.pallas_call(
        _student_pooler_kernel,
        out_shape=jax.ShapeDtypeStruct((B, H_out), jnp.float32),
        grid=grid,
        in_specs=[
            pl.BlockSpec((B, H_in), lambda j: (0, 0)),                # x (resident)
            pl.BlockSpec((Lp2, H_in, TN), lambda j: (0, 0, j)),       # packed weight planes
            pl.BlockSpec((1, TN), lambda j: (0, j)),                  # finished student bias
            pl.BlockSpec(memory_space=pltpu.MemorySpace.SMEM),        # W_l (weight generator)
        ],
        out_specs=pl.BlockSpec((B, TN), lambda j: (0, j)),
        compiler_params=pltpu.CompilerParams(
            dimension_semantics=("parallel",),        # independent H_out tiles -> v7x 2-TC split
            vmem_limit_bytes=vmem_limit),
        cost_estimate=cost,
    )(x, prep["w_planes"], student_b, prep["wl_w"])


# --------------------------------------------------------------------------------------
# References.
# --------------------------------------------------------------------------------------
def _reference_forward(hidden_states, p):
    """Pure-JAX, full-f32 reference mirroring the PyTorch module exactly."""
    x = hidden_states[:, 0]
    sw = jnp.tanh((p["subset_w"] * p["wl_w"][:, 0]).sum(-1)) * p["ww"] + p["bw"]   # (H_out, H_in)
    sb = jnp.tanh((p["subset_b"] @ p["wl_b"])[:, 0]) * p["wb"] + p["bb"]           # (H_out,)
    y = jnp.dot(x, sw.T, precision=jax.lax.Precision.HIGHEST)
    return jnp.tanh(y + sb)


def _reference_from_prepared(hidden_states, prep):
    """Same math as the kernel, on the prepared (packed, bf16-stored) params."""
    x = hidden_states[:, 0].astype(jnp.bfloat16)
    wp = prep["w_planes"].astype(jnp.float32)                           # (L+2, H_in, H_out)
    L = wp.shape[0] - 2
    acc_w = (wp[:L] * prep["wl_w"][0][:, None, None]).sum(0)
    student_w = jnp.tanh(acc_w) * wp[L] + wp[L + 1]                     # (H_in, H_out)
    student_b = jnp.tanh((prep["subset_b"] @ prep["wl_b"])[:, 0]) * prep["wb"] + prep["bb"]
    y = jnp.dot(x, student_w.astype(jnp.bfloat16), preferred_element_type=jnp.float32)
    return jnp.tanh(y + student_b[None, :])


if __name__ == "__main__":
    B, S, H, L = 2, 8, 32, 2   # batch, seq, hidden_size, num adjacent teacher layers

    key = jax.random.PRNGKey(0)
    k_hs, k_sw, k_sb, k_wlw, k_wlb = jax.random.split(key, 5)

    hidden_states = jax.random.normal(k_hs, (B, S, H), jnp.float32)

    # Synthetic "teacher" pooler weight/bias group (stand-in for TeacherWeightGroup;
    # num_student_layers=1, layer_index=1 -> the full stacked subset).
    # TODO(synk): TeacherWeightGroup's named_parameters harvesting from a live teacher
    #             nn.Module is pure Python bookkeeping with no kernel equivalent; the
    #             already-extracted subsets are taken as inputs here.
    subset_w = 0.02 * jax.random.normal(k_sw, (H, H, L), jnp.float32)   # (out, in, L)
    subset_b = 0.02 * jax.random.normal(k_sb, (H, L), jnp.float32)      # (out, L)

    # W_l: xavier_uniform_ on shape (L, 1)  ->  bound = sqrt(6 / (L + 1))
    bound = math.sqrt(6.0 / (L + 1))
    wl_w = jax.random.uniform(k_wlw, (L, 1), jnp.float32, -bound, bound)
    wl_b = jax.random.uniform(k_wlb, (L, 1), jnp.float32, -bound, bound)

    params = {
        "subset_w": subset_w,
        "subset_b": subset_b,
        "wl_w": wl_w,
        "wl_b": wl_b,
        "ww": jnp.ones((H, H), jnp.float32),    # WeightGenerator.W
        "bw": jnp.zeros((H, H), jnp.float32),   # WeightGenerator.B
        "wb": jnp.ones((H,), jnp.float32),      # BiasGenerator.W
        "bb": jnp.zeros((H,), jnp.float32),     # BiasGenerator.B
    }

    # One-time prep (would be cached across forward calls in a real model).
    prepared = prepare_student_pooler_params(params, param_dtype=jnp.bfloat16)

    out = student_bert_pooler(hidden_states, prepared)
    out = jax.block_until_ready(out)
    assert out.shape == (B, H)

    # Tight check: kernel vs identical math on the same (bf16-stored, packed) params.
    ref_prep = _reference_from_prepared(hidden_states, prepared)
    assert jnp.allclose(out, ref_prep, atol=5e-3, rtol=5e-3), \
        "kernel mismatch vs prepared-param reference"

    # Loose check: faithful to the original full-f32 PyTorch semantics
    # (bf16 weight/x storage for the MXU pass only).
    ref_exact = _reference_forward(hidden_states, params)
    assert jnp.allclose(out, ref_exact, atol=2e-2, rtol=2e-2), \
        "kernel mismatch vs exact f32 reference"

    print("KERNEL_OK")
</pallas_src>

<mosaic_0001>
module attributes {stable_mosaic.version = 11 : i64} {
  func.func @_student_pooler_kernel(%arg0: i32, %arg1: memref<2x32xbf16, #tpu.memory_space<vmem>>, %arg2: memref<4x32x32xbf16, #tpu.memory_space<vmem>>, %arg3: memref<1x32xf32, #tpu.memory_space<vmem>>, %arg4: memref<1x2xf32, #tpu.memory_space<smem>>, %arg5: memref<2x32xf32, #tpu.memory_space<vmem>>) attributes {dimension_semantics = [#tpu.dimension_semantics<parallel>], iteration_bounds = array<i64: 1>, scalar_prefetch = 0 : i64, scratch_operands = 0 : i64, tpu.core_type = #tpu.core_type<tc>, window_params = [{pipeline_mode = #tpu.pipeline_mode<synchronous>, transform_indices = @transform_0, window_bounds = array<i64: 2, 32>}, {transform_indices = @transform_1, window_bounds = array<i64: 4, 32, 32>}, {transform_indices = @transform_2, window_bounds = array<i64: 1, 32>}, {transform_indices = @transform_3, window_bounds = array<i64: 1, 2>}, {transform_indices = @transform_4, window_bounds = array<i64: 2, 32>}]} {
    %c0 = arith.constant 0 : index
    %c0_0 = arith.constant 0 : index
    %c0_1 = arith.constant 0 : index
    %0 = vector.load %arg2[%c0, %c0_0, %c0_1] : memref<4x32x32xbf16, #tpu.memory_space<vmem>>, vector<1x32x32xbf16>
    %1 = vector.shape_cast %0 : vector<1x32x32xbf16> to vector<32x32xbf16>
    %2 = arith.extf %1 : vector<32x32xbf16> to vector<32x32xf32>
    %c0_2 = arith.constant 0 : index
    %c0_3 = arith.constant 0 : index
    %3 = memref.load %arg4[%c0_2, %c0_3] : memref<1x2xf32, #tpu.memory_space<smem>>
    %4 = vector.broadcast %3 : f32 to vector<32x32xf32>
    %5 = arith.mulf %2, %4 : vector<32x32xf32>
    %c1 = arith.constant 1 : index
    %c0_4 = arith.constant 0 : index
    %c0_5 = arith.constant 0 : index
    %6 = vector.load %arg2[%c1, %c0_4, %c0_5] : memref<4x32x32xbf16, #tpu.memory_space<vmem>>, vector<1x32x32xbf16>
    %7 = vector.shape_cast %6 : vector<1x32x32xbf16> to vector<32x32xbf16>
    %8 = arith.extf %7 : vector<32x32xbf16> to vector<32x32xf32>
    %c0_6 = arith.constant 0 : index
    %c1_7 = arith.constant 1 : index
    %9 = memref.load %arg4[%c0_6, %c1_7] : memref<1x2xf32, #tpu.memory_space<smem>>
    %10 = vector.broadcast %9 : f32 to vector<32x32xf32>
    %11 = arith.mulf %8, %10 : vector<32x32xf32>
    %12 = arith.addf %5, %11 : vector<32x32xf32>
    %13 = math.tanh %12 : vector<32x32xf32>
    %c2 = arith.constant 2 : index
    %c0_8 = arith.constant 0 : index
    %c0_9 = arith.constant 0 : index
    %14 = vector.load %arg2[%c2, %c0_8, %c0_9] : memref<4x32x32xbf16, #tpu.memory_space<vmem>>, vector<1x32x32xbf16>
    %15 = vector.shape_cast %14 : vector<1x32x32xbf16> to vector<32x32xbf16>
    %16 = arith.extf %15 : vector<32x32xbf16> to vector<32x32xf32>
    %17 = arith.mulf %13, %16 : vector<32x32xf32>
    %c3 = arith.constant 3 : index
    %c0_10 = arith.constant 0 : index
    %c0_11 = arith.constant 0 : index
    %18 = vector.load %arg2[%c3, %c0_10, %c0_11] : memref<4x32x32xbf16, #tpu.memory_space<vmem>>, vector<1x32x32xbf16>
    %19 = vector.shape_cast %18 : vector<1x32x32xbf16> to vector<32x32xbf16>
    %20 = arith.extf %19 : vector<32x32xbf16> to vector<32x32xf32>
    %21 = arith.addf %17, %20 : vector<32x32xf32>
    %c0_12 = arith.constant 0 : index
    %c0_13 = arith.constant 0 : index
    %22 = vector.load %arg1[%c0_12, %c0_13] : memref<2x32xbf16, #tpu.memory_space<vmem>>, vector<2x32xbf16>
    %23 = arith.truncf %21 : vector<32x32xf32> to vector<32x32xbf16>
    %cst = arith.constant dense<0.000000e+00> : vector<2x32xf32>
    %24 = tpu.matmul %22, %23, %cst {dimension_numbers = #tpu.dot_dimension_numbers<[1], [0], [0], [1], [0, 0, 1, 1], [], []>} : vector<2x32xbf16>, vector<32x32xbf16>, vector<2x32xf32> -> vector<2x32xf32>
    %c0_14 = arith.constant 0 : index
    %c0_15 = arith.constant 0 : index
    %25 = vector.load %arg3[%c0_14, %c0_15] : memref<1x32xf32, #tpu.memory_space<vmem>>, vector<1x32xf32>
    %26 = vector.broadcast %25 : vector<1x32xf32> to vector<2x32xf32>
    %27 = arith.addf %24, %26 : vector<2x32xf32>
    %28 = math.tanh %27 : vector<2x32xf32>
    %c0_16 = arith.constant 0 : index
    %c0_17 = arith.constant 0 : index
    %29 = vector.load %arg5[%c0_16, %c0_17] : memref<2x32xf32, #tpu.memory_space<vmem>>, vector<2x32xf32>
    tpu.vector_store %arg5[%c0_16, %c0_17], %28 {strides = array<i32>} : memref<2x32xf32, #tpu.memory_space<vmem>>, vector<2x32xf32>,
    return
  }
  func.func @transform_0(%arg0: i32) -> (i32, i32) {
    %c0_i32 = arith.constant 0 : i32
    %c0_i32_0 = arith.constant 0 : i32
    %c0_i32_1 = arith.constant 0 : i32
    return %c0_i32, %c0_i32_0 : i32, i32
  }
  func.func @transform_1(%arg0: i32) -> (i32, i32, i32) {
    %c0_i32 = arith.constant 0 : i32
    %c0_i32_0 = arith.constant 0 : i32
    %c0_i32_1 = arith.constant 0 : i32
    return %c0_i32, %c0_i32_0, %arg0 : i32, i32, i32
  }
  func.func @transform_2(%arg0: i32) -> (i32, i32) {
    %c0_i32 = arith.constant 0 : i32
    %c0_i32_0 = arith.constant 0 : i32
    return %c0_i32, %arg0 : i32, i32
  }
  func.func @transform_3(%arg0: i32) -> (i32, i32) {
    %c0_i32 = arith.constant 0 : i32
    %c0_i32_0 = arith.constant 0 : i32
    %c0_i32_1 = arith.constant 0 : i32
    return %c0_i32, %c0_i32_0 : i32, i32
  }
  func.func @transform_4(%arg0: i32) -> (i32, i32) {
    %c0_i32 = arith.constant 0 : i32
    %c0_i32_0 = arith.constant 0 : i32
    return %c0_i32, %arg0 : i32, i32
  }
}

</mosaic_0001>

<bundles_post_ra>
// kernel: tpu_custom_call.1
= control target key start
LH: loop header
LB: loop body
LE: loop exit
PB: predicated region body
PF: predicated region fallthrough
CT: control target
= control target key end

     0   :  { %9 = vsyncpa [#allocation3], 0  ;;  %s364_s0 = inlined_call_operand.hbm [shape: bf16[2,32], index: 0, kind: input, shape index: {}]   ;;  %s365_s1 = inlined_call_operand.hbm [shape: bf16[4,32,32], index: 1, kind: input, shape index: {}]   ;;  %s366_s2 = inlined_call_operand.vmem [shape: f32[1,32], index: 2, kind: input, shape index: {}]   ;;  %s367_s3 = inlined_call_operand.vmem [shape: f32[1,2], index: 3, kind: input, shape index: {}]   ;;  %s368_s4 = inlined_call_operand.hbm [shape: f32[2,32], index: 4, kind: output, shape index: {}]  }
   0x1   :  { %10 = vsyncpa [#allocation7], 0 }
   0x2   :  { %11 = vsyncpa [#allocation5], 0 }
   0x3   :  { %12 = vsyncpa [#allocation4], 0  ;;  %s18_s17 = sshll.u32 %s364_s0, 4  ;;  %s318_s18 = smov [#allocation2]   ;;  %s19_s17 = int_to_ptr.hbm [resolvable:$true] %s18_s17 }
   0x4   :  { %s20_s19 = sshll.u32 %s318_s18, 4  ;;  %s28_s22 = sshll.u32 %s365_s1, 4  ;;  %s21_s19 = int_to_ptr.vmem [resolvable:$true] %s20_s19  ;;  %s29_s22 = int_to_ptr.hbm [resolvable:$true] %s28_s22 }
   0x5   :  { %23 = dma.hbm_to_vmem [thread:$0]  %s19_s17, 16, %s21_s19, [#allocation3]  }
   0x6   :  { %s319_s23 = smov [#allocation6]   ;;  %s320_s25 = smov 64  }
   0x7   :  { %s30_s24 = sshll.u32 %s319_s23, 4  ;;  %s321_s26 = smov 4   ;;  %s31_s24 = int_to_ptr.vmem [resolvable:$true] %s30_s24 }
   0x8   :  { %36 = dma.hbm_to_vmem [thread:$0]  %s29_s22, 1024, %s31_s24, [#allocation7], %s320_s25, %s320_s25, %s321_s26  }
   0x9   :  { %s44_s0 = sshll.u32 %s367_s3, 4  ;;  %s322_s29 = smov [#allocation8]   ;;  %s45_s0 = int_to_ptr.vmem [resolvable:$true] %s44_s0 }
   0xa   :  { %47 = dma.vmem_to_smem %s45_s0, 16, %s322_s29, [#allocation5]  }
   0xb   :  { %310 = dma.done.wait [#allocation3], 16  }
   0xc   :  { %311 = vsyncadd [#allocation3], 4294967280 }
   0xd   :  { %312 = dma.done.wait [#allocation7], 1024  }
   0xe   :  { %313 = vsyncadd [#allocation7], 4294966272 }
   0xf   :  { %314 = dma.done.wait [#allocation5], 16  }
  0x10   :  { %315 = vsyncadd [#allocation5], 4294967280 }
  0x11   :  { %60 = sfence }
  0x12   :  { %v205_v0 = vld [vmem:[#allocation6 + $0x8] sm:$0xff]   ;;  %s70_s1 = sld [smem:[#allocation8]]  ;;  %v206_v1 = vld [vmem:[#allocation6 + $0x18] sm:$0xff]   ;;  %v174_v2 = vld [vmem:[#allocation6] sm:$0xff]   ;;  %vm132_vm0 = vcmask 261120   ;;  %s323_s6 = smov [#allocation9]  }
  0x13   :  { %s171_s30 = sld [smem:[#allocation8 + $0x1]]  ;;  %v182_v3 = vld [vmem:[#allocation6 + $0x10] sm:$0xff]   ;;  %v179_v4 = vunpack.c.l.bf16 %v205_v0  ;;  %v180_v5 = vunpack.c.h.bf16 %v205_v0  ;;  %v175_v6 = vunpack.c.l.bf16 %v174_v2  ;;  %v187_v7 = vunpack.c.l.bf16 %v206_v1  ;;  %v207_v26 = vld [vmem:[#allocation6 + $0x28] sm:$0xff]   ;;  %v208_v27 = vld [vmem:[#allocation6 + $0x38] sm:$0xff]   ;;  %s157_s7 = sshll.u32 %s323_s6, 4  ;;  %s158_s7 = int_to_ptr.vmem [resolvable:$true] %s157_s7 }
  0x14   :  { %v188_v8 = vunpack.c.h.bf16 %v206_v1  ;;  %v176_v9 = vunpack.c.h.bf16 %v174_v2  ;;  %v183_v10 = vunpack.c.l.bf16 %v182_v3  ;;  %v184_v11 = vunpack.c.h.bf16 %v182_v3  ;;  %v190_v28 = vld [vmem:[#allocation6 + $0x20] sm:$0xff]   ;;  %v198_v31 = vld [vmem:[#allocation6 + $0x30] sm:$0xff]   ;;  %v125_v52 = vld [vmem:[#allocation2] sm:$0x1]  ;;  %s159_s10 = sshll.u32 %s368_s4, 4  ;;  %s160_s10 = int_to_ptr.hbm [resolvable:$true] %s159_s10 }
  0x15   :  { %v195_v29 = vunpack.c.l.bf16 %v207_v26  ;;  %v196_v30 = vunpack.c.h.bf16 %v207_v26  ;;  %v203_v32 = vunpack.c.l.bf16 %v208_v27  ;;  %v191_v33 = vunpack.c.l.bf16 %v190_v28  ;;  %v215_v53 = vld [vmem:[%s366_s2] ss:$0 sm:$0xff] }
  0x16   :  { %v204_v35 = vunpack.c.h.bf16 %v208_v27  ;;  %v192_v36 = vunpack.c.h.bf16 %v190_v28  ;;  %v199_v39 = vunpack.c.l.bf16 %v198_v31  ;;  %v200_v42 = vunpack.c.h.bf16 %v198_v31 }
  0x17   :  { %vm150_vm1 = vcmask 254976  }
  0x18   :  { %v71_v12 = vstv %s70_s1 }
  0x19   :  { %v74_v13 = vmul.f32 %v179_v4, %v71_v12  ;;  %v75_v14 = vmul.f32 %v180_v5, %v71_v12  ;;  %v86_v15 = vstv %s171_s30  ;;  %v72_v16 = vmul.f32 %v175_v6, %v71_v12 }
  0x1a   :  { %v89_v17 = vmul.f32 %v187_v7, %v86_v15  ;;  %v90_v18 = vmul.f32 %v188_v8, %v86_v15  ;;  %v73_v19 = vmul.f32 %v176_v9, %v71_v12  ;;  %v87_v20 = vmul.f32 %v183_v10, %v86_v15 }
  0x1b   :  { %v88_v21 = vmul.f32 %v184_v11, %v86_v15 }
  0x1c   :  { %v93_v22 = vadd.f32 %v89_v17, %v74_v13  ;;  %v94_v23 = vadd.f32 %v90_v18, %v75_v14  ;;  %v91_v24 = vadd.f32 %v87_v20, %v72_v16 }
  0x1d   :  { %v92_v25 = vadd.f32 %v88_v21, %v73_v19 }
  0x1e   :  { %216 = vtanh.f32 %v93_v22 }
  0x1f   :  { %218 = vtanh.f32 %v94_v23 }
  0x20   :  { %220 = vtanh.f32 %v91_v24 }
  0x21   :  { %222 = vtanh.f32 %v92_v25 }
  0x24   :  { %v217_v34 = vpop.eup %216 }
  0x25   :  { %v219_v37 = vpop.eup %218  ;;  %v110_v38 = vmul.f32 %v217_v34, %v195_v29 }
  0x26   :  { %v221_v40 = vpop.eup %220  ;;  %v111_v41 = vmul.f32 %v219_v37, %v196_v30 }
  0x27   :  { %v223_v43 = vpop.eup %222  ;;  %v123_v44 = vadd.f32 %v203_v32, %v110_v38  ;;  %v108_v45 = vmul.f32 %v221_v40, %v191_v33 }
  0x28   :  { %v124_v46 = vadd.f32 %v204_v35, %v111_v41  ;;  %v109_v47 = vmul.f32 %v223_v43, %v192_v36 }
  0x29   :  { %v121_v48 = vadd.f32 %v199_v39, %v108_v45 }
  0x2a   :  { %v127_v49 = vpack.c.bf16 %v124_v46, %v123_v44  ;;  %v122_v50 = vadd.f32 %v200_v42, %v109_v47 }
  0x2c   :  { %142 = vmatpush.bf16.msra.mxu0 %v127_v49  ;;  %v126_v51 = vpack.c.bf16 %v122_v50, %v121_v48 }
  0x30   :  { %143 = vmatpush.bf16.msra.mxu0 %v126_v51 }
  0x33   :  { %172 = vmatmul.msk.bf16.vlgmr.msra.gmra.mxu0 %vm132_vm0, %v125_v52 }
  0xb0   :  { %v145_v54 = vpop.f32.mrf.mxu0 }
  0xb1   :  { %v146_v55 = vadd.f32 %v215_v53, %v145_v54 }
  0xb3   :  { %224 = vtanh.f32 %v146_v55 }
  0xb8   :  { %v147_v56 = vpop.f32.mrf.mxu0 }
  0xb9   :  { %v225_v57 = vpop.eup %224 }
  0xba   :  { %151 = vst.msk [vmem:[#allocation9] sm:$0x3] %vm150_vm1, %v225_v57 }
  0xbb   :  { %162 = dma.vmem_to_hbm [thread:$0]  %s158_s7, 32, %s160_s10, [#allocation4]  }
  0xbc   :  { %316 = dma.done.wait [#allocation4], 32  }
  0xbd   :  { %317 = vsyncadd [#allocation4], 4294967264 }
  0xbe   :  { %167 = vsyncpa [#allocation3], 1 }
  0xbf   :  { %168 = vsyncpa [#allocation7], 1 }
  0xc0   :  { %169 = vsyncpa [#allocation4], 1 }
  0xc1   :  { %170 = vsyncpa [#allocation5], 1 }

</bundles_post_ra>
